<compile_context>
chip_gen: v7x
topology: tpu7x:2x2x1
jax: 0.10.0
libtpu: 0.0.40
codegen_flags: <defaults>
</compile_context>

<pallas_src>
import functools

import jax
import jax.numpy as jnp
from jax.experimental import pallas as pl
from jax.experimental.pallas import tpu as pltpu

IN_DIM = 28 * 28          # 784
K_PAD = 896               # 7 * 128: padded contraction dim (full MXU K-passes)
HID_DIM = 30
OUT_DIM = 10


def _mlp_kernel(x_ref, w1_ref, b1_ref, w2_ref, b2_ref, o_ref):
    # fc1: Linear + ReLU.  bf16 MXU operands, f32 accumulation.
    h = jnp.dot(x_ref[...], w1_ref[...], preferred_element_type=jnp.float32)
    h = jnp.maximum(h + b1_ref[...], 0.0)            # bias + ReLU in f32 (VPU)
    # fc2: Linear.  Hidden activation stays in vregs; cast to bf16 for the MXU.
    out = jnp.dot(h.astype(w2_ref.dtype), w2_ref[...],
                  preferred_element_type=jnp.float32)
    o_ref[...] = (out + b2_ref[...]).astype(o_ref.dtype)


def _round_up(x, m):
    return (x + m - 1) // m * m


@functools.partial(jax.jit, static_argnames=("tm",))
def net_forward(x, w1, b1, w2, b2, tm=1024):
    """Forward pass of Net:  relu(x @ w1 + b1) @ w2 + b2.

    x:  [B, 784] float32 (flattened 28x28 images)
    w1: [784, 30] (transpose of torch's [30, 784]),  b1: [30]
    w2: [30, 10]  (transpose of torch's [10, 30]),   b2: [10]
    returns [B, 10] float32
    """
    B = x.shape[0]
    # Batch tile: streamed axis. Clamp for small batches; keep a multiple of 8.
    TM = min(tm, _round_up(B, 8))
    B_pad = _round_up(B, TM)
    grid = (B_pad // TM,)

    # bf16 MXU operands (halves the dominant HBM stream: x); f32 accumulation.
    x_p = jnp.zeros((B_pad, K_PAD), jnp.bfloat16).at[:B, :IN_DIM].set(
        x.astype(jnp.bfloat16))
    w1_p = jnp.zeros((K_PAD, HID_DIM), jnp.bfloat16).at[:IN_DIM, :].set(
        w1.astype(jnp.bfloat16))
    w2_b = w2.astype(jnp.bfloat16)
    b1_r = b1.reshape(1, HID_DIM).astype(jnp.float32)
    b2_r = b2.reshape(1, OUT_DIM).astype(jnp.float32)

    # VMEM budget: double-buffered x / out tiles + resident weights + margin.
    vmem_bytes = (2 * TM * K_PAD * 2                 # x tiles (bf16, 2 buffers)
                  + 2 * TM * OUT_DIM * 4             # out tiles (f32, 2 buffers)
                  + 2 * (K_PAD * HID_DIM * 2         # w1
                         + HID_DIM * OUT_DIM * 2     # w2
                         + HID_DIM * 4 + OUT_DIM * 4)  # biases
                  + (8 << 20))                       # headroom
    vmem_bytes = max(int(vmem_bytes), 16 << 20)      # safe floor on all chips

    cost = pl.CostEstimate(
        flops=2 * B_pad * (K_PAD * HID_DIM + HID_DIM * OUT_DIM),
        transcendentals=0,
        bytes_accessed=(B_pad * K_PAD * 2            # x stream (bf16)
                        + B_pad * OUT_DIM * 4        # output writeback
                        + K_PAD * HID_DIM * 2 + HID_DIM * OUT_DIM * 2
                        + (HID_DIM + OUT_DIM) * 4),
    )

    out = pl.pallas_call(
        _mlp_kernel,
        out_shape=jax.ShapeDtypeStruct((B_pad, OUT_DIM), jnp.float32),
        grid=grid,
        in_specs=[
            pl.BlockSpec((TM, K_PAD), lambda i: (i, 0)),         # x: streamed
            pl.BlockSpec((K_PAD, HID_DIM), lambda i: (0, 0)),    # w1: resident
            pl.BlockSpec((1, HID_DIM), lambda i: (0, 0)),        # b1: resident
            pl.BlockSpec((HID_DIM, OUT_DIM), lambda i: (0, 0)),  # w2: resident
            pl.BlockSpec((1, OUT_DIM), lambda i: (0, 0)),        # b2: resident
        ],
        out_specs=pl.BlockSpec((TM, OUT_DIM), lambda i: (i, 0)),
        compiler_params=pltpu.CompilerParams(
            dimension_semantics=("parallel",),   # shard batch tiles across TCs
            vmem_limit_bytes=vmem_bytes,
        ),
        cost_estimate=cost,
    )(x_p, w1_p, b1_r, w2_b, b2_r)

    return out[:B]


def init_params(key):
    """Deterministic init mimicking torch.nn.Linear default U(-1/sqrt(fan_in), .)."""
    k1, k2, k3, k4 = jax.random.split(key, 4)
    bound1 = 1.0 / jnp.sqrt(jnp.float32(IN_DIM))
    bound2 = 1.0 / jnp.sqrt(jnp.float32(HID_DIM))
    # Stored as [in, out] (transpose of torch's [out, in]) so the kernel does x @ W.
    w1 = jax.random.uniform(k1, (IN_DIM, HID_DIM), jnp.float32, -bound1, bound1)
    b1 = jax.random.uniform(k2, (HID_DIM,), jnp.float32, -bound1, bound1)
    w2 = jax.random.uniform(k3, (HID_DIM, OUT_DIM), jnp.float32, -bound2, bound2)
    b2 = jax.random.uniform(k4, (OUT_DIM,), jnp.float32, -bound2, bound2)
    return w1, b1, w2, b2


def _ref_forward(x, w1, b1, w2, b2):
    return jnp.maximum(x @ w1 + b1[None, :], 0.0) @ w2 + b2[None, :]


if __name__ == "__main__":
    key = jax.random.PRNGKey(0)
    k_x1, k_x2, k_p = jax.random.split(key, 3)
    w1, b1, w2, b2 = init_params(k_p)

    # Small single-tile case (grid of 1).
    B1 = 8
    x1 = jax.random.normal(k_x1, (B1, IN_DIM), jnp.float32)
    out1 = jax.block_until_ready(net_forward(x1, w1, b1, w2, b2))
    ref1 = _ref_forward(x1, w1, b1, w2, b2)
    assert out1.shape == (B1, OUT_DIM)
    assert jnp.allclose(out1, ref1, atol=5e-2, rtol=5e-2), (
        float(jnp.max(jnp.abs(out1 - ref1))))

    # Multi-tile streaming case with a ragged tail (B=20, TM=8 -> 3 grid steps).
    B2 = 20
    x2 = jax.random.normal(k_x2, (B2, IN_DIM), jnp.float32)
    out2 = jax.block_until_ready(net_forward(x2, w1, b1, w2, b2, tm=8))
    ref2 = _ref_forward(x2, w1, b1, w2, b2)
    assert out2.shape == (B2, OUT_DIM)
    assert jnp.allclose(out2, ref2, atol=5e-2, rtol=5e-2), (
        float(jnp.max(jnp.abs(out2 - ref2))))

    print("KERNEL_OK")
</pallas_src>

<mosaic_0001>
module attributes {stable_mosaic.version = 11 : i64} {
  func.func @_mlp_kernel(%arg0: i32, %arg1: memref<8x896xbf16, #tpu.memory_space<vmem>>, %arg2: memref<896x30xbf16, #tpu.memory_space<vmem>>, %arg3: memref<1x30xf32, #tpu.memory_space<vmem>>, %arg4: memref<30x10xbf16, #tpu.memory_space<vmem>>, %arg5: memref<1x10xf32, #tpu.memory_space<vmem>>, %arg6: memref<8x10xf32, #tpu.memory_space<vmem>>) attributes {dimension_semantics = [#tpu.dimension_semantics<parallel>], iteration_bounds = array<i64: 1>, scalar_prefetch = 0 : i64, scratch_operands = 0 : i64, tpu.core_type = #tpu.core_type<tc>, window_params = [{transform_indices = @transform_0, window_bounds = array<i64: 8, 896>}, {pipeline_mode = #tpu.pipeline_mode<synchronous>, transform_indices = @transform_1, window_bounds = array<i64: 896, 30>}, {pipeline_mode = #tpu.pipeline_mode<synchronous>, transform_indices = @transform_2, window_bounds = array<i64: 1, 30>}, {pipeline_mode = #tpu.pipeline_mode<synchronous>, transform_indices = @transform_3, window_bounds = array<i64: 30, 10>}, {pipeline_mode = #tpu.pipeline_mode<synchronous>, transform_indices = @transform_4, window_bounds = array<i64: 1, 10>}, {transform_indices = @transform_5, window_bounds = array<i64: 8, 10>}]} {
    %c0 = arith.constant 0 : index
    %c0_0 = arith.constant 0 : index
    %0 = vector.load %arg1[%c0, %c0_0] : memref<8x896xbf16, #tpu.memory_space<vmem>>, vector<8x896xbf16>
    %c0_1 = arith.constant 0 : index
    %c0_2 = arith.constant 0 : index
    %1 = vector.load %arg2[%c0_1, %c0_2] : memref<896x30xbf16, #tpu.memory_space<vmem>>, vector<896x30xbf16>
    %cst = arith.constant dense<0.000000e+00> : vector<8x30xf32>
    %2 = tpu.matmul %0, %1, %cst {dimension_numbers = #tpu.dot_dimension_numbers<[1], [0], [0], [1], [0, 0, 1, 1], [], []>} : vector<8x896xbf16>, vector<896x30xbf16>, vector<8x30xf32> -> vector<8x30xf32>
    %c0_3 = arith.constant 0 : index
    %c0_4 = arith.constant 0 : index
    %3 = vector.load %arg3[%c0_3, %c0_4] : memref<1x30xf32, #tpu.memory_space<vmem>>, vector<1x30xf32>
    %4 = vector.broadcast %3 : vector<1x30xf32> to vector<8x30xf32>
    %5 = arith.addf %2, %4 : vector<8x30xf32>
    %cst_5 = arith.constant 0.000000e+00 : f32
    %6 = vector.broadcast %cst_5 : f32 to vector<8x30xf32>
    %7 = arith.maximumf %5, %6 : vector<8x30xf32>
    %8 = arith.truncf %7 : vector<8x30xf32> to vector<8x30xbf16>
    %c0_6 = arith.constant 0 : index
    %c0_7 = arith.constant 0 : index
    %9 = vector.load %arg4[%c0_6, %c0_7] : memref<30x10xbf16, #tpu.memory_space<vmem>>, vector<30x10xbf16>
    %cst_8 = arith.constant dense<0.000000e+00> : vector<8x10xf32>
    %10 = tpu.matmul %8, %9, %cst_8 {dimension_numbers = #tpu.dot_dimension_numbers<[1], [0], [0], [1], [0, 0, 1, 1], [], []>} : vector<8x30xbf16>, vector<30x10xbf16>, vector<8x10xf32> -> vector<8x10xf32>
    %c0_9 = arith.constant 0 : index
    %c0_10 = arith.constant 0 : index
    %11 = vector.load %arg5[%c0_9, %c0_10] : memref<1x10xf32, #tpu.memory_space<vmem>>, vector<1x10xf32>
    %12 = vector.broadcast %11 : vector<1x10xf32> to vector<8x10xf32>
    %13 = arith.addf %10, %12 : vector<8x10xf32>
    %c0_11 = arith.constant 0 : index
    %c0_12 = arith.constant 0 : index
    %14 = vector.load %arg6[%c0_11, %c0_12] : memref<8x10xf32, #tpu.memory_space<vmem>>, vector<8x10xf32>
    tpu.vector_store %arg6[%c0_11, %c0_12], %13 {strides = array<i32>} : memref<8x10xf32, #tpu.memory_space<vmem>>, vector<8x10xf32>,
    return
  }
  func.func @transform_0(%arg0: i32) -> (i32, i32) {
    %c0_i32 = arith.constant 0 : i32
    %c0_i32_0 = arith.constant 0 : i32
    return %arg0, %c0_i32 : i32, i32
  }
  func.func @transform_1(%arg0: i32) -> (i32, i32) {
    %c0_i32 = arith.constant 0 : i32
    %c0_i32_0 = arith.constant 0 : i32
    %c0_i32_1 = arith.constant 0 : i32
    return %c0_i32, %c0_i32_0 : i32, i32
  }
  func.func @transform_2(%arg0: i32) -> (i32, i32) {
    %c0_i32 = arith.constant 0 : i32
    %c0_i32_0 = arith.constant 0 : i32
    %c0_i32_1 = arith.constant 0 : i32
    return %c0_i32, %c0_i32_0 : i32, i32
  }
  func.func @transform_3(%arg0: i32) -> (i32, i32) {
    %c0_i32 = arith.constant 0 : i32
    %c0_i32_0 = arith.constant 0 : i32
    %c0_i32_1 = arith.constant 0 : i32
    return %c0_i32, %c0_i32_0 : i32, i32
  }
  func.func @transform_4(%arg0: i32) -> (i32, i32) {
    %c0_i32 = arith.constant 0 : i32
    %c0_i32_0 = arith.constant 0 : i32
    %c0_i32_1 = arith.constant 0 : i32
    return %c0_i32, %c0_i32_0 : i32, i32
  }
  func.func @transform_5(%arg0: i32) -> (i32, i32) {
    %c0_i32 = arith.constant 0 : i32
    %c0_i32_0 = arith.constant 0 : i32
    return %arg0, %c0_i32 : i32, i32
  }
}

</mosaic_0001>

<bundles_post_ra>
// kernel: net_forward.1
= control target key start
LH: loop header
LB: loop body
LE: loop exit
PB: predicated region body
PF: predicated region fallthrough
CT: control target
= control target key end

     0   :  { %v1020_v42 = vmov 0.0   ;;  %vm1021_vm0 = vmmov 0   ;;  %s1271_s0 = inlined_call_operand.vmem [shape: bf16[8,896], index: 0, kind: input, shape index: {}]   ;;  %s1272_s1 = inlined_call_operand.vmem [shape: bf16[896,30], index: 1, kind: input, shape index: {}]   ;;  %s1273_s2 = inlined_call_operand.vmem [shape: f32[1,30], index: 2, kind: input, shape index: {}]   ;;  %s1274_s3 = inlined_call_operand.vmem [shape: bf16[30,10], index: 3, kind: input, shape index: {}]   ;;  %s1275_s4 = inlined_call_operand.vmem [shape: f32[1,10], index: 4, kind: input, shape index: {}]   ;;  %s1276_s5 = inlined_call_operand.hbm [shape: f32[8,10], index: 5, kind: output, shape index: {}]  }
   0x1   :  { %v931_v0 = vld [vmem:[%s1272_s1 + $0x40] sm:$0xff]   ;;  %v935_v4 = vld [vmem:[%s1272_s1 + $0x48] sm:$0xff]   ;;  %v939_v8 = vld [vmem:[%s1272_s1 + $0x50] sm:$0xff]  }
   0x2   :  { %v932_v1 = vld [vmem:[%s1272_s1] sm:$0xff]   ;;  %822 = vmatprep.subr.bf16.mxu0 %v931_v0  ;;  %v936_v5 = vld [vmem:[%s1272_s1 + $0x8] sm:$0xff]   ;;  %v940_v9 = vld [vmem:[%s1272_s1 + $0x10] sm:$0xff]  }
   0x3   :  { %v933_v2 = vld [vmem:[%s1272_s1 + $0xc0] sm:$0xff]   ;;  %823 = vmatpush3.bf16.msra.mxu0 %v932_v1  ;;  %v937_v6 = vld [vmem:[%s1272_s1 + $0xc8] sm:$0xff]   ;;  %v941_v10 = vld [vmem:[%s1272_s1 + $0xd0] sm:$0xff]  }
   0x4   :  { %v934_v3 = vld [vmem:[%s1272_s1 + $0x80] sm:$0xff]   ;;  %844 = vmatprep.subr.bf16.mxu1 %v933_v2  ;;  %824 = vmatprep.subr.bf16.mxu0 %v935_v4  ;;  %v938_v7 = vld [vmem:[%s1272_s1 + $0x88] sm:$0xff]   ;;  %v942_v11 = vld [vmem:[%s1272_s1 + $0x90] sm:$0xff]  }
   0x5   :  { %845 = vmatpush3.bf16.msra.mxu1 %v934_v3  ;;  %v943_v12 = vld [vmem:[%s1272_s1 + $0x58] sm:$0xff]   ;;  %v947_v16 = vld [vmem:[%s1272_s1 + $0x60] sm:$0xff]   ;;  %v951_v20 = vld [vmem:[%s1272_s1 + $0x68] sm:$0xff]  }
   0x6   :  { %846 = vmatprep.subr.bf16.mxu1 %v937_v6  ;;  %v944_v13 = vld [vmem:[%s1272_s1 + $0x18] sm:$0xff]   ;;  %v948_v17 = vld [vmem:[%s1272_s1 + $0x20] sm:$0xff]   ;;  %v952_v21 = vld [vmem:[%s1272_s1 + $0x28] sm:$0xff]  }
   0x7   :  { %825 = vmatpush3.bf16.msra.mxu0 %v936_v5  ;;  %v945_v14 = vld [vmem:[%s1272_s1 + $0xd8] sm:$0xff]   ;;  %v949_v18 = vld [vmem:[%s1272_s1 + $0xe0] sm:$0xff]   ;;  %v953_v22 = vld [vmem:[%s1272_s1 + $0xe8] sm:$0xff]  }
   0x8   :  { %826 = vmatprep.subr.bf16.mxu0 %v939_v8  ;;  %v946_v15 = vld [vmem:[%s1272_s1 + $0x98] sm:$0xff]   ;;  %v950_v19 = vld [vmem:[%s1272_s1 + $0xa0] sm:$0xff]   ;;  %v954_v23 = vld [vmem:[%s1272_s1 + $0xa8] sm:$0xff]  }
   0x9   :  { %847 = vmatpush3.bf16.msra.mxu1 %v938_v7  ;;  %v955_v24 = vld [vmem:[%s1272_s1 + $0x70] sm:$0xff]   ;;  %v959_v28 = vld [vmem:[%s1272_s1 + $0x78] sm:$0xff]   ;;  %v22_v31 = vld [vmem:[%s1271_s0] sm:$0xff] }
   0xa   :  { %848 = vmatprep.subr.bf16.mxu1 %v941_v10  ;;  %v956_v25 = vld [vmem:[%s1272_s1 + $0x30] sm:$0xff]   ;;  %v960_v29 = vld [vmem:[%s1272_s1 + $0x38] sm:$0xff]   ;;  %v755_v32 = vcombine.low %v22_v31, %v22_v31  ;;  %v756_v33 = vcombine.high %v22_v31, %v22_v31  ;;  %v965_v35 = vld [vmem:[%s1272_s1 + $0x140] sm:$0xff]  }
   0xb   :  { %827 = vmatpush3.bf16.msra.mxu0 %v940_v9  ;;  %v957_v26 = vld [vmem:[%s1272_s1 + $0xf0] sm:$0xff]   ;;  %v961_v30 = vld [vmem:[%s1272_s1 + $0xf8] sm:$0xff]   ;;  %v23_v36 = vld [vmem:[%s1271_s0 + $0x8] sm:$0xff] }
   0xc   :  { %828 = vmatprep.subr.bf16.mxu0 %v943_v12  ;;  %v958_v27 = vld [vmem:[%s1272_s1 + $0xb0] sm:$0xff]   ;;  %v964_v34 = vld [vmem:[%s1272_s1 + $0xb8] sm:$0xff]   ;;  %538 = vmatprep.mubr.bf16.mxu0 %v756_v33  ;;  %v757_v37 = vcombine.low %v23_v36, %v23_v36  ;;  %v758_v38 = vcombine.high %v23_v36, %v23_v36  ;;  %v968_v39 = vld [vmem:[%s1272_s1 + $0x100] sm:$0xff]  }
   0xd   :  { %849 = vmatpush3.bf16.msra.mxu1 %v942_v11  ;;  %v969_v40 = vld [vmem:[%s1272_s1 + $0x180] sm:$0xff]   ;;  %v970_v41 = vld [vmem:[%s1272_s1 + $0x148] sm:$0xff]   ;;  %v973_v45 = vld [vmem:[%s1272_s1 + $0x150] sm:$0xff]  }
   0xe   :  { %850 = vmatprep.subr.bf16.mxu1 %v945_v14  ;;  %578 = vmatprep.mubr.bf16.mxu1 %v758_v38  ;;  %v971_v43 = vld [vmem:[%s1272_s1 + $0x108] sm:$0xff]   ;;  %v974_v46 = vld [vmem:[%s1272_s1 + $0x110] sm:$0xff]   ;;  %v976_v48 = vld [vmem:[%s1272_s1 + $0x158] sm:$0xff]  }
   0xf   :  { %829 = vmatpush3.bf16.msra.mxu0 %v944_v13  ;;  %v972_v44 = vld [vmem:[%s1272_s1 + $0x188] sm:$0xff]   ;;  %v975_v47 = vld [vmem:[%s1272_s1 + $0x190] sm:$0xff]   ;;  %v977_v49 = vld [vmem:[%s1272_s1 + $0x118] sm:$0xff]  }
  0x10   :  { %830 = vmatprep.subr.bf16.mxu0 %v947_v16  ;;  %v979_v50 = vld [vmem:[%s1272_s1 + $0x160] sm:$0xff]   ;;  %v978_v51 = vld [vmem:[%s1272_s1 + $0x198] sm:$0xff]   ;;  %v982_v53 = vld [vmem:[%s1272_s1 + $0x168] sm:$0xff]  }
  0x11   :  { %851 = vmatpush3.bf16.msra.mxu1 %v946_v15  ;;  %v980_v52 = vld [vmem:[%s1272_s1 + $0x120] sm:$0xff]   ;;  %v983_v55 = vld [vmem:[%s1272_s1 + $0x128] sm:$0xff]   ;;  %v985_v56 = vld [vmem:[%s1272_s1 + $0x170] sm:$0xff]  }
  0x12   :  { %852 = vmatprep.subr.bf16.mxu1 %v949_v18  ;;  %v981_v54 = vld [vmem:[%s1272_s1 + $0x1a0] sm:$0xff]   ;;  %v984_v57 = vld [vmem:[%s1272_s1 + $0x1a8] sm:$0xff]   ;;  %v986_v58 = vld [vmem:[%s1272_s1 + $0x130] sm:$0xff]  }
  0x13   :  { %831 = vmatpush3.bf16.msra.mxu0 %v948_v17  ;;  %v24_v59 = vld [vmem:[%s1271_s0 + $0x10] sm:$0xff]  ;;  %v988_v62 = vld [vmem:[%s1272_s1 + $0x178] sm:$0xff]  }
  0x14   :  { %832 = vmatprep.subr.bf16.mxu0 %v951_v20  ;;  %v987_v60 = vld [vmem:[%s1272_s1 + $0x1b0] sm:$0xff]   ;;  %v760_v61 = vcombine.high %v24_v59, %v24_v59 }
  0x15   :  { %853 = vmatpush3.bf16.msra.mxu1 %v950_v19 }
  0x16   :  { %854 = vmatprep.subr.bf16.mxu1 %v953_v22 }
  0x17   :  { %833 = vmatpush3.bf16.msra.mxu0 %v952_v21 }
  0x18   :  { %834 = vmatprep.subr.bf16.mxu0 %v955_v24 }
  0x19   :  { %855 = vmatpush3.bf16.msra.mxu1 %v954_v23 }
  0x1a   :  { %856 = vmatprep.subr.bf16.mxu1 %v957_v26 }
  0x1b   :  { %835 = vmatpush3.bf16.msra.mxu0 %v956_v25 }
  0x1c   :  { %836 = vmatprep.subr.bf16.mxu0 %v959_v28 }
  0x1d   :  { %857 = vmatpush3.bf16.msra.mxu1 %v958_v27 }
  0x1e   :  { %858 = vmatprep.subr.bf16.mxu1 %v961_v30 }
  0x1f   :  { %837 = vmatpush3.bf16.msra.mxu0 %v960_v29 }
  0x20   :  { %866 = vmatprep.subr.bf16.mxu0 %v965_v35 }
  0x21   :  { %859 = vmatpush3.bf16.msra.mxu1 %v964_v34 }
  0x22   :  { %539 = vmatmul.mubr.bf16.vlgmr.msra.gmra.mrb[0].mxu0 %v755_v32  ;;  %900 = vmatprep.subr.bf16.mxu1 %v1020_v42 }
  0x23   :  { %867 = vmatpush3.bf16.msra.mxu0 %v968_v39  ;;  %618 = vmatprep.mubr.bf16.mxu0 %v760_v61 }
  0x24   :  { %579 = vmatmul.mubr.bf16.vlgmr.msra.gmra.mrb[0].mxu1 %v757_v37  ;;  %868 = vmatprep.subr.bf16.mxu0 %v970_v41 }
  0x25   :  { %901 = vmatpush3.bf16.msra.mxu1 %v969_v40  ;;  %916 = vmatprep.mubr.msk.bf16.mxu1 %vm1021_vm0, %v1020_v42 }
  0x26   :  { %902 = vmatprep.subr.bf16.mxu1 %v1020_v42 }
  0x27   :  { %869 = vmatpush3.bf16.msra.mxu0 %v971_v43 }
  0x28   :  { %870 = vmatprep.subr.bf16.mxu0 %v973_v45 }
  0x29   :  { %903 = vmatpush3.bf16.msra.mxu1 %v972_v44 }
  0x2a   :  { %904 = vmatprep.subr.bf16.mxu1 %v1020_v42 }
  0x2b   :  { %871 = vmatpush3.bf16.msra.mxu0 %v974_v46 }
  0x2c   :  { %872 = vmatprep.subr.bf16.mxu0 %v976_v48 }
  0x2d   :  { %905 = vmatpush3.bf16.msra.mxu1 %v975_v47 }
  0x2e   :  { %906 = vmatprep.subr.bf16.mxu1 %v1020_v42 }
  0x2f   :  { %873 = vmatpush3.bf16.msra.mxu0 %v977_v49 }
  0x30   :  { %874 = vmatprep.subr.bf16.mxu0 %v979_v50 }
  0x31   :  { %907 = vmatpush3.bf16.msra.mxu1 %v978_v51 }
  0x32   :  { %908 = vmatprep.subr.bf16.mxu1 %v1020_v42 }
  0x33   :  { %875 = vmatpush3.bf16.msra.mxu0 %v980_v52 }
  0x34   :  { %876 = vmatprep.subr.bf16.mxu0 %v982_v53 }
  0x35   :  { %909 = vmatpush3.bf16.msra.mxu1 %v981_v54 }
  0x36   :  { %910 = vmatprep.subr.bf16.mxu1 %v1020_v42 }
  0x37   :  { %877 = vmatpush3.bf16.msra.mxu0 %v983_v55 }
  0x38   :  { %878 = vmatprep.subr.bf16.mxu0 %v985_v56 }
  0x39   :  { %911 = vmatpush3.bf16.msra.mxu1 %v984_v57 }
  0x3a   :  { %912 = vmatprep.subr.bf16.mxu1 %v1020_v42 }
  0x3b   :  { %10 = vsyncpa [#allocation3], 0  ;;  %879 = vmatpush3.bf16.msra.mxu0 %v986_v58  ;;  %v989_v63 = vld [vmem:[%s1272_s1 + $0x138] sm:$0xff]   ;;  %v759_v1 = vcombine.low %v24_v59, %v24_v59  ;;  %v994_v3 = vld [vmem:[%s1274_s3] sm:$0xff]   ;;  %vm694_vm1 = vcmask 1046528   ;;  %vm690_vm2 = vcmask 244736  }
  0x3c   :  { %880 = vmatprep.subr.bf16.mxu0 %v988_v62  ;;  %v992_v0 = vld [vmem:[%s1272_s1 + $0x1b8] sm:$0xff]   ;;  %v995_v4 = vld [vmem:[%s1274_s3 + $0x8] sm:$0x7f]   ;;  %v754_v7 = vld [vmem:[%s1273_s2] ss:$0 sm:$0xff]  ;;  %s1022_s17 = smov [#allocation2]  }
  0x3d   :  { %913 = vmatpush3.bf16.msra.mxu1 %v987_v60  ;;  %v993_v2 = vld [vmem:[%s1271_s0 + $0x18] ss:$0 sps:$4 sm:$0xff]   ;;  %v696_v5 = vsel %vm694_vm1, %v995_v4, 0  ;;  %v818_v32 = vld [vmem:[%s1275_s4] ss:$0 sm:$0xff]  ;;  %s746_s18 = sshll.u32 %s1022_s17, 4  ;;  %s747_s18 = int_to_ptr.vmem [resolvable:$true] %s746_s18 }
  0x3e   :  { %914 = vmatprep.subr.bf16.mxu1 %v1020_v42  ;;  %vm738_vm3 = vcmask 80896   ;;  %s996_s19 = scalar_lea.vmem %s747_s18, 128  ;;  %p1001_p1 = scmp.lt.s32.totalorder %s747_s18, %s747_s18 }
  0x3f   :  { %881 = vmatpush3.bf16.msra.mxu0 %v989_v63  ;;  %p997_p0 = scmp.ne.s32.totalorder %s747_s18, %s996_s19  ;;  %p1002_p2 = scmp.lt.s32.totalorder %s996_s19, %s996_s19 }
  0x40   :  { %920 = vmatprep.subr.bf16.mxu0 %v1020_v42 }
  0x41   :  { %915 = vmatpush3.bf16.msra.mxu1 %v992_v0  ;;  %p1003_p3 = por %p1002_p2, %p1001_p1 }
  0x42   :  { %619 = vmatmul.mubr.bf16.vlgmr.msra.gmra.mrb[4].mxu0 %v759_v1 }
  0x43   :  { %924 = vmatprep.mubr.msk.bf16.mxu0 %vm1021_vm0, %v1020_v42  ;;  %921 = vmatpush3.bf16.msra.mxu0 %v994_v3  ;;  %p1004_p4 = pnand %p1003_p3, %p997_p0 }
  0x44   :  { %917 = vmatmul.mubr.bf16.vlgmr.msra.gmra.mrb[4].mxu1 %v993_v2  ;;  %922 = vmatprep.subr.bf16.mxu0 %v1020_v42 }
  0x47   :  { %923 = vmatpush3.bf16.msra.mxu0 %v696_v5 }
  0xf5   :  { %v838_v6 = vpop.f32.mrb[0].mxu0 }
  0xf6   :  { %v839_v8 = vpop.f32.mrb[1].mxu0 }
  0xf7   :  { %v840_v9 = vadd.f32 %v839_v8, %v838_v6  ;;  %v841_v10 = vpop.f32.mrb[2].mxu0  ;;  %v860_v11 = vpop.f32.mrb[0].mxu1 }
  0xf8   :  { %v842_v12 = vpop.f32.mrb[3].mxu0  ;;  %v861_v13 = vpop.f32.mrb[1].mxu1 }
  0xf9   :  { %v541_v14 = vadd.f32 %v840_v9, %v754_v7  ;;  %v862_v15 = vadd.f32 %v861_v13, %v860_v11  ;;  %v863_v16 = vpop.f32.mrb[2].mxu1 }
  0xfa   :  { %v864_v17 = vpop.f32.mrb[3].mxu1 }
  0xfb   :  { %v581_v18 = vadd.f32 %v862_v15, %v541_v14 }
 0x115   :  { %v882_v19 = vpop.f32.mrb[4].mxu0 }
 0x116   :  { %v883_v20 = vpop.f32.mrb[5].mxu0 }
 0x117   :  { %v884_v21 = vadd.f32 %v883_v20, %v882_v19  ;;  %v885_v22 = vpop.f32.mrb[6].mxu0  ;;  %v660_v23 = vpop.f32.mrb[4].mxu1 }
 0x118   :  { %v886_v24 = vpop.f32.mrb[7].mxu0  ;;  %v918_v25 = vpop.f32.mrb[5].mxu1 }
 0x119   :  { %v621_v26 = vadd.f32 %v884_v21, %v581_v18  ;;  %v663_v27 = vpop.f32.mrb[6].mxu1 }
 0x11a   :  { %v919_v28 = vpop.f32.mrb[7].mxu1 }
 0x11b   :  { %v661_v29 = vadd.f32 %v660_v23, %v621_v26 }
 0x11d   :  { %v666_v30 = vmax.f32 %v661_v29, 0.0 }
 0x11f   :  { %v667_v31 = vpack.c.bf16 %v666_v30, %v666_v30 }
 0x121   :  { %925 = vmatmul.mubr.msk.bf16.vlgmr.msra.gmra.mrb[8].mxu0 %vm690_vm2, %v667_v31 }
 0x1f4   :  { %v732_v33 = vpop.f32.mrb[8].mxu0 }
 0x1f5   :  { %v733_v34 = vadd.f32 %v818_v32, %v732_v33  ;;  %v926_v35 = vpop.f32.mrb[9].mxu0 }
 0x1f6   :  { %v735_v36 = vpop.f32.mrb[10].mxu0 }
 0x1f7   :  { %v927_v37 = vpop.f32.mrb[11].mxu0  ;;  %739 = vst.msk [vmem:[#allocation2] sm:$0xff] %vm738_vm3, %v733_v34 }
 0x1f8   :  { %1007 = shalt.err (!%p1004_p4)
}
 0x1f9   :  { %s1008_s4 = scalar_lea.hbm %s1276_s5, 128 }
 0x1fa   :  { %p1009_p5 = scmp.ne.s32.totalorder %s1276_s5, %s1008_s4  ;;  %p1012_p6 = scmp.lt.u32.totalorder %s1008_s4, %s1276_s5 }
 0x1fc   :  { %p1014_p7 = pnand %p1012_p6, %p1009_p5 }
 0x1fe   :  { %1017 = shalt.err (!%p1014_p7)
}
 0x1ff   :  { %749 = dma.vmem_to_hbm [thread:$0]  %s747_s18, 128, %s1276_s5, [#allocation3]  }
 0x200   :  { %1018 = dma.done.wait [#allocation3], 128  }
 0x201   :  { %1019 = vsyncadd [#allocation3], 4294967168 }
 0x202   :  { %753 = vsyncpa [#allocation3], 1 }

</bundles_post_ra>
